<compile_context>
chip_gen: v7x
topology: tpu7x:2x2x1
jax: 0.10.0
libtpu: 0.0.40
codegen_flags: <defaults>
</compile_context>

<pallas_src>
import jax
import jax.numpy as jnp
from jax.experimental import pallas as pl
from jax.experimental.pallas import tpu as pltpu


# ----------------------------- config ---------------------------------------
DIM_IN = 4
DIM_OUT = 3
NET_WIDTH = 32          # config['n_neurons']
NET_DEPTH = 5           # config['n_hidden_layers']
SKIP_LAYER = 4          # config.get('skip_layer', 4)
# hidden_activation = ReLU, output_activation = Identity (key absent in config)
# bias_enabled = True, output_enabled = True

PACK = 4                # samples packed per 128-lane row
SLOT = NET_WIDTH        # lanes per sample slot (32); input/output padded to this
LANES = PACK * SLOT     # 128 -> lane-dense loads/stores, full 128-wide MXU K/N
TM_MAX_PACKED = 2048    # packed-row tile cap (= 8192 samples, ~1.5 MiB VMEM/step)

# The split-output-matmul rewrite is only valid when the single skip concat
# happens immediately before the output layer (true for depth=5, skip=4).
_SKIP_LAYERS = tuple(i for i in range(NET_DEPTH)
                     if SKIP_LAYER is not None and i % SKIP_LAYER == 0 and i > 0)
assert _SKIP_LAYERS == (NET_DEPTH - 1,)
assert DIM_IN <= SLOT and DIM_OUT <= SLOT


# ----------------------------- kernel ---------------------------------------
def nerf_mlp_kernel(x_ref, wh_ref, bh_ref, wo_ref, bo_ref, o_ref):
    # x_ref : (TM, 128) bf16  packed [s0|s1|s2|s3], slot = [input(4), zeros(28)]
    # wh_ref: (NET_DEPTH, 128, 128) bf16 block-diag (layer-0 rows >= DIM_IN zero)
    # bh_ref: (NET_DEPTH, 1, 128)   f32  (per-layer bias tiled x4)
    # wo_ref: (2, 128, 128) bf16 block-diag  [0]=hidden part, [1]=skip-input part
    # bo_ref: (1, 128)              f32  (output bias tiled x4 into slots)
    # o_ref : (TM, 128)             f32  packed output, slot = [out(3), zeros(29)]
    x_in = x_ref[...]                                           # bf16 (TM, 128)
    x = x_in
    for i in range(NET_DEPTH):                                  # static unroll
        h = jnp.dot(x, wh_ref[i], preferred_element_type=jnp.float32)
        h = jnp.maximum(h + bh_ref[i], 0.0)                     # f32 bias + ReLU
        x = h.astype(jnp.bfloat16)                              # bf16 matmul operand

    # Output layer: skip concat [x, inputs] folded into two MXU pushes that
    # sum in the same f32 accumulator (algebraically identical, no relayout).
    out = jnp.dot(x, wo_ref[0], preferred_element_type=jnp.float32)
    out = out + jnp.dot(x_in, wo_ref[1], preferred_element_type=jnp.float32)
    o_ref[...] = out + bo_ref[...]                              # Identity output act.


# ----------------------------- wrapper ---------------------------------------
def _tile_plan(n):
    """Packed-row tile size & grid length: even #steps, balanced across 2 TCs."""
    m = -(-n // PACK)                         # packed rows holding real samples
    g = max(2, -(-m // TM_MAX_PACKED))        # >= 2 grid steps
    if g % 2:                                 # even step count -> balanced on v7x
        g += 1
    tm = -(-m // g)                           # balanced tile
    tm = max(8, -(-tm // 8) * 8)              # 8-sublane multiple
    return tm, g, g * tm                      # (tile, steps, padded packed rows)


def nerf_mlp_forward(x, packed):
    """x: (N, DIM_IN) f32. packed = (wh, bh, wo, bo) from pack_params()."""
    wh, bh, wo, bo = packed
    n = x.shape[0]
    tm, g, m_pad = _tile_plan(n)
    n_pad = m_pad * PACK

    # Pad batch + features, cast matmul operand to bf16, pack 4 samples / row.
    xp = jnp.zeros((n_pad, SLOT), jnp.bfloat16)
    xp = xp.at[:n, :DIM_IN].set(x.astype(jnp.bfloat16))
    xp = xp.reshape(m_pad, LANES)             # contiguous reshape: free

    flops = 2 * m_pad * (NET_DEPTH + 2) * LANES * LANES
    bytes_accessed = (xp.size * 2 + m_pad * LANES * 4
                      + wh.size * 2 + bh.size * 4 + wo.size * 2 + bo.size * 4)

    out = pl.pallas_call(
        nerf_mlp_kernel,
        out_shape=jax.ShapeDtypeStruct((m_pad, LANES), jnp.float32),
        grid_spec=pltpu.PrefetchScalarGridSpec(
            num_scalar_prefetch=0,
            grid=(g,),
            in_specs=[
                pl.BlockSpec((tm, LANES), lambda i: (i, 0)),
                pl.BlockSpec(wh.shape, lambda i: (0, 0, 0)),   # constant-index params:
                pl.BlockSpec(bh.shape, lambda i: (0, 0, 0)),   # fetched once, resident
                pl.BlockSpec(wo.shape, lambda i: (0, 0, 0)),
                pl.BlockSpec(bo.shape, lambda i: (0, 0)),
            ],
            out_specs=pl.BlockSpec((tm, LANES), lambda i: (i, 0)),
        ),
        compiler_params=pltpu.CompilerParams(
            dimension_semantics=("parallel",),
            vmem_limit_bytes=32 * 1024 * 1024,
        ),
        cost_estimate=pl.CostEstimate(
            flops=flops, transcendentals=0, bytes_accessed=bytes_accessed),
    )(xp, wh, bh, wo, bo)

    # Unpack: (m_pad, 128) -> (n_pad, 32) is a free reshape; small final slice.
    return out.reshape(n_pad, SLOT)[:n, :DIM_OUT]


# ----------------------------- parameter init --------------------------------
def xavier_uniform(key, fan_out, fan_in):
    # torch.nn.init.xavier_uniform_ on a (out, in) weight, pre-transposed to (in, out)
    bound = (6.0 / (fan_in + fan_out)) ** 0.5
    w_pt = jax.random.uniform(key, (fan_out, fan_in), jnp.float32, -bound, bound)
    return w_pt.T


def build_params(key):
    """Replicates NeRFMLP.__init__ layer sizing + initialize()."""
    weights, biases = [], []
    in_features = DIM_IN
    for i in range(NET_DEPTH):
        key, sub = jax.random.split(key)
        weights.append(xavier_uniform(sub, NET_WIDTH, in_features))
        biases.append(jnp.zeros((NET_WIDTH,), jnp.float32))      # bias_init = zeros_
        if SKIP_LAYER is not None and i % SKIP_LAYER == 0 and i > 0:
            in_features = NET_WIDTH + DIM_IN
        else:
            in_features = NET_WIDTH
    key, sub = jax.random.split(key)
    weights.append(xavier_uniform(sub, DIM_OUT, in_features))    # output layer
    biases.append(jnp.zeros((DIM_OUT,), jnp.float32))
    return weights, biases


def pack_params(weights, biases):
    """Pack 12 per-layer tensors into 4 block-diagonal kernel buffers."""
    eye = jnp.eye(PACK, dtype=jnp.float32)
    wh_list, bh_list = [], []
    for i in range(NET_DEPTH):
        w = weights[i]                                           # (in_i, 32), in_i in {4, 32}
        blk = jnp.zeros((SLOT, SLOT), jnp.float32).at[:w.shape[0], :].set(w)
        wh_list.append(jnp.kron(eye, blk))                       # (128, 128) block-diag
        bh_list.append(jnp.tile(biases[i], PACK)[None, :])       # (1, 128)
    wh = jnp.stack(wh_list)                                      # (5, 128, 128)
    bh = jnp.stack(bh_list)                                      # (5, 1, 128)

    w_out = weights[-1]                                          # (36, 3): 0..31 hidden, 32..35 input
    blk_h = jnp.zeros((SLOT, SLOT), jnp.float32).at[:, :DIM_OUT].set(w_out[:NET_WIDTH])
    blk_s = jnp.zeros((SLOT, SLOT), jnp.float32).at[:DIM_IN, :DIM_OUT].set(w_out[NET_WIDTH:])
    wo = jnp.stack([jnp.kron(eye, blk_h), jnp.kron(eye, blk_s)]) # (2, 128, 128)

    bo_slot = jnp.zeros((SLOT,), jnp.float32).at[:DIM_OUT].set(biases[-1])
    bo = jnp.tile(bo_slot, PACK)[None, :]                        # (1, 128)
    return (wh.astype(jnp.bfloat16), bh, wo.astype(jnp.bfloat16), bo)


# ----------------------------- pure-JAX references ----------------------------
def nerf_mlp_ref(x, weights, biases, matmul_dtype=jnp.float32):
    """Exact module forward (concat skip); matmul_dtype mimics the kernel's casts."""
    inputs = x
    for i in range(NET_DEPTH):
        h = jnp.dot(x.astype(matmul_dtype), weights[i].astype(matmul_dtype),
                    preferred_element_type=jnp.float32) + biases[i]
        x = jnp.maximum(h, 0.0)
        if SKIP_LAYER is not None and i % SKIP_LAYER == 0 and i > 0:
            x = jnp.concatenate([x, inputs], axis=-1)
    x = jnp.dot(x.astype(matmul_dtype), weights[-1].astype(matmul_dtype),
                preferred_element_type=jnp.float32) + biases[-1]
    return x


# ----------------------------- main ------------------------------------------
if __name__ == "__main__":
    key = jax.random.PRNGKey(0)
    key, kx, kp = jax.random.split(key, 3)

    N = 256
    x = jax.random.normal(kx, (N, DIM_IN), jnp.float32)
    weights, biases = build_params(kp)
    packed = pack_params(weights, biases)

    out = jax.block_until_ready(nerf_mlp_forward(x, packed))
    assert out.shape == (N, DIM_OUT)

    # Algorithm-matched reference (bf16 matmul operands, f32 accum): tight check.
    ref_bf16 = nerf_mlp_ref(x, weights, biases, matmul_dtype=jnp.bfloat16)
    assert jnp.allclose(out, ref_bf16, atol=1e-3, rtol=1e-3), \
        float(jnp.max(jnp.abs(out - ref_bf16)))

    # Full-precision module semantics: loose check (covers bf16 operand rounding).
    ref_f32 = nerf_mlp_ref(x, weights, biases, matmul_dtype=jnp.float32)
    assert jnp.allclose(out, ref_f32, atol=5e-2, rtol=5e-2), \
        float(jnp.max(jnp.abs(out - ref_f32)))

    # Ragged / padded-batch path (non-multiple of PACK and of the tile).
    x2 = jax.random.normal(kx, (37, DIM_IN), jnp.float32)
    out2 = jax.block_until_ready(nerf_mlp_forward(x2, packed))
    ref2 = nerf_mlp_ref(x2, weights, biases, matmul_dtype=jnp.bfloat16)
    assert out2.shape == (37, DIM_OUT)
    assert jnp.allclose(out2, ref2, atol=1e-3, rtol=1e-3)

    print("KERNEL_OK")
</pallas_src>

<mosaic_0001>
module attributes {stable_mosaic.version = 11 : i64} {
  func.func @nerf_mlp_kernel(%arg0: i32, %arg1: memref<32x128xbf16, #tpu.memory_space<vmem>>, %arg2: memref<5x128x128xbf16, #tpu.memory_space<vmem>>, %arg3: memref<5x1x128xf32, #tpu.memory_space<vmem>>, %arg4: memref<2x128x128xbf16, #tpu.memory_space<vmem>>, %arg5: memref<1x128xf32, #tpu.memory_space<vmem>>, %arg6: memref<32x128xf32, #tpu.memory_space<vmem>>) attributes {dimension_semantics = [#tpu.dimension_semantics<parallel>], iteration_bounds = array<i64: 2>, scalar_prefetch = 0 : i64, scratch_operands = 0 : i64, tpu.core_type = #tpu.core_type<tc>, window_params = [{transform_indices = @transform_0, window_bounds = array<i64: 32, 128>}, {pipeline_mode = #tpu.pipeline_mode<synchronous>, transform_indices = @transform_1, window_bounds = array<i64: 5, 128, 128>}, {pipeline_mode = #tpu.pipeline_mode<synchronous>, transform_indices = @transform_2, window_bounds = array<i64: 5, 1, 128>}, {pipeline_mode = #tpu.pipeline_mode<synchronous>, transform_indices = @transform_3, window_bounds = array<i64: 2, 128, 128>}, {pipeline_mode = #tpu.pipeline_mode<synchronous>, transform_indices = @transform_4, window_bounds = array<i64: 1, 128>}, {transform_indices = @transform_5, window_bounds = array<i64: 32, 128>}]} {
    %c0 = arith.constant 0 : index
    %c0_0 = arith.constant 0 : index
    %0 = vector.load %arg1[%c0, %c0_0] : memref<32x128xbf16, #tpu.memory_space<vmem>>, vector<32x128xbf16>
    %c0_1 = arith.constant 0 : index
    %c0_2 = arith.constant 0 : index
    %c0_3 = arith.constant 0 : index
    %1 = vector.load %arg2[%c0_1, %c0_2, %c0_3] : memref<5x128x128xbf16, #tpu.memory_space<vmem>>, vector<1x128x128xbf16>
    %2 = vector.shape_cast %1 : vector<1x128x128xbf16> to vector<128x128xbf16>
    %cst = arith.constant dense<0.000000e+00> : vector<32x128xf32>
    %3 = tpu.matmul %0, %2, %cst {dimension_numbers = #tpu.dot_dimension_numbers<[1], [0], [0], [1], [0, 0, 1, 1], [], []>} : vector<32x128xbf16>, vector<128x128xbf16>, vector<32x128xf32> -> vector<32x128xf32>
    %c0_4 = arith.constant 0 : index
    %c0_5 = arith.constant 0 : index
    %c0_6 = arith.constant 0 : index
    %4 = vector.load %arg3[%c0_4, %c0_5, %c0_6] : memref<5x1x128xf32, #tpu.memory_space<vmem>>, vector<1x1x128xf32>
    %5 = vector.shape_cast %4 : vector<1x1x128xf32> to vector<1x128xf32>
    %6 = vector.broadcast %5 : vector<1x128xf32> to vector<32x128xf32>
    %7 = arith.addf %3, %6 : vector<32x128xf32>
    %cst_7 = arith.constant 0.000000e+00 : f32
    %8 = vector.broadcast %cst_7 : f32 to vector<32x128xf32>
    %9 = arith.maximumf %7, %8 : vector<32x128xf32>
    %10 = arith.truncf %9 : vector<32x128xf32> to vector<32x128xbf16>
    %c1 = arith.constant 1 : index
    %c0_8 = arith.constant 0 : index
    %c0_9 = arith.constant 0 : index
    %11 = vector.load %arg2[%c1, %c0_8, %c0_9] : memref<5x128x128xbf16, #tpu.memory_space<vmem>>, vector<1x128x128xbf16>
    %12 = vector.shape_cast %11 : vector<1x128x128xbf16> to vector<128x128xbf16>
    %cst_10 = arith.constant dense<0.000000e+00> : vector<32x128xf32>
    %13 = tpu.matmul %10, %12, %cst_10 {dimension_numbers = #tpu.dot_dimension_numbers<[1], [0], [0], [1], [0, 0, 1, 1], [], []>} : vector<32x128xbf16>, vector<128x128xbf16>, vector<32x128xf32> -> vector<32x128xf32>
    %c1_11 = arith.constant 1 : index
    %c0_12 = arith.constant 0 : index
    %c0_13 = arith.constant 0 : index
    %14 = vector.load %arg3[%c1_11, %c0_12, %c0_13] : memref<5x1x128xf32, #tpu.memory_space<vmem>>, vector<1x1x128xf32>
    %15 = vector.shape_cast %14 : vector<1x1x128xf32> to vector<1x128xf32>
    %16 = vector.broadcast %15 : vector<1x128xf32> to vector<32x128xf32>
    %17 = arith.addf %13, %16 : vector<32x128xf32>
    %cst_14 = arith.constant 0.000000e+00 : f32
    %18 = vector.broadcast %cst_14 : f32 to vector<32x128xf32>
    %19 = arith.maximumf %17, %18 : vector<32x128xf32>
    %20 = arith.truncf %19 : vector<32x128xf32> to vector<32x128xbf16>
    %c2 = arith.constant 2 : index
    %c0_15 = arith.constant 0 : index
    %c0_16 = arith.constant 0 : index
    %21 = vector.load %arg2[%c2, %c0_15, %c0_16] : memref<5x128x128xbf16, #tpu.memory_space<vmem>>, vector<1x128x128xbf16>
    %22 = vector.shape_cast %21 : vector<1x128x128xbf16> to vector<128x128xbf16>
    %cst_17 = arith.constant dense<0.000000e+00> : vector<32x128xf32>
    %23 = tpu.matmul %20, %22, %cst_17 {dimension_numbers = #tpu.dot_dimension_numbers<[1], [0], [0], [1], [0, 0, 1, 1], [], []>} : vector<32x128xbf16>, vector<128x128xbf16>, vector<32x128xf32> -> vector<32x128xf32>
    %c2_18 = arith.constant 2 : index
    %c0_19 = arith.constant 0 : index
    %c0_20 = arith.constant 0 : index
    %24 = vector.load %arg3[%c2_18, %c0_19, %c0_20] : memref<5x1x128xf32, #tpu.memory_space<vmem>>, vector<1x1x128xf32>
    %25 = vector.shape_cast %24 : vector<1x1x128xf32> to vector<1x128xf32>
    %26 = vector.broadcast %25 : vector<1x128xf32> to vector<32x128xf32>
    %27 = arith.addf %23, %26 : vector<32x128xf32>
    %cst_21 = arith.constant 0.000000e+00 : f32
    %28 = vector.broadcast %cst_21 : f32 to vector<32x128xf32>
    %29 = arith.maximumf %27, %28 : vector<32x128xf32>
    %30 = arith.truncf %29 : vector<32x128xf32> to vector<32x128xbf16>
    %c3 = arith.constant 3 : index
    %c0_22 = arith.constant 0 : index
    %c0_23 = arith.constant 0 : index
    %31 = vector.load %arg2[%c3, %c0_22, %c0_23] : memref<5x128x128xbf16, #tpu.memory_space<vmem>>, vector<1x128x128xbf16>
    %32 = vector.shape_cast %31 : vector<1x128x128xbf16> to vector<128x128xbf16>
    %cst_24 = arith.constant dense<0.000000e+00> : vector<32x128xf32>
    %33 = tpu.matmul %30, %32, %cst_24 {dimension_numbers = #tpu.dot_dimension_numbers<[1], [0], [0], [1], [0, 0, 1, 1], [], []>} : vector<32x128xbf16>, vector<128x128xbf16>, vector<32x128xf32> -> vector<32x128xf32>
    %c3_25 = arith.constant 3 : index
    %c0_26 = arith.constant 0 : index
    %c0_27 = arith.constant 0 : index
    %34 = vector.load %arg3[%c3_25, %c0_26, %c0_27] : memref<5x1x128xf32, #tpu.memory_space<vmem>>, vector<1x1x128xf32>
    %35 = vector.shape_cast %34 : vector<1x1x128xf32> to vector<1x128xf32>
    %36 = vector.broadcast %35 : vector<1x128xf32> to vector<32x128xf32>
    %37 = arith.addf %33, %36 : vector<32x128xf32>
    %cst_28 = arith.constant 0.000000e+00 : f32
    %38 = vector.broadcast %cst_28 : f32 to vector<32x128xf32>
    %39 = arith.maximumf %37, %38 : vector<32x128xf32>
    %40 = arith.truncf %39 : vector<32x128xf32> to vector<32x128xbf16>
    %c4 = arith.constant 4 : index
    %c0_29 = arith.constant 0 : index
    %c0_30 = arith.constant 0 : index
    %41 = vector.load %arg2[%c4, %c0_29, %c0_30] : memref<5x128x128xbf16, #tpu.memory_space<vmem>>, vector<1x128x128xbf16>
    %42 = vector.shape_cast %41 : vector<1x128x128xbf16> to vector<128x128xbf16>
    %cst_31 = arith.constant dense<0.000000e+00> : vector<32x128xf32>
    %43 = tpu.matmul %40, %42, %cst_31 {dimension_numbers = #tpu.dot_dimension_numbers<[1], [0], [0], [1], [0, 0, 1, 1], [], []>} : vector<32x128xbf16>, vector<128x128xbf16>, vector<32x128xf32> -> vector<32x128xf32>
    %c4_32 = arith.constant 4 : index
    %c0_33 = arith.constant 0 : index
    %c0_34 = arith.constant 0 : index
    %44 = vector.load %arg3[%c4_32, %c0_33, %c0_34] : memref<5x1x128xf32, #tpu.memory_space<vmem>>, vector<1x1x128xf32>
    %45 = vector.shape_cast %44 : vector<1x1x128xf32> to vector<1x128xf32>
    %46 = vector.broadcast %45 : vector<1x128xf32> to vector<32x128xf32>
    %47 = arith.addf %43, %46 : vector<32x128xf32>
    %cst_35 = arith.constant 0.000000e+00 : f32
    %48 = vector.broadcast %cst_35 : f32 to vector<32x128xf32>
    %49 = arith.maximumf %47, %48 : vector<32x128xf32>
    %50 = arith.truncf %49 : vector<32x128xf32> to vector<32x128xbf16>
    %c0_36 = arith.constant 0 : index
    %c0_37 = arith.constant 0 : index
    %c0_38 = arith.constant 0 : index
    %51 = vector.load %arg4[%c0_36, %c0_37, %c0_38] : memref<2x128x128xbf16, #tpu.memory_space<vmem>>, vector<1x128x128xbf16>
    %52 = vector.shape_cast %51 : vector<1x128x128xbf16> to vector<128x128xbf16>
    %cst_39 = arith.constant dense<0.000000e+00> : vector<32x128xf32>
    %53 = tpu.matmul %50, %52, %cst_39 {dimension_numbers = #tpu.dot_dimension_numbers<[1], [0], [0], [1], [0, 0, 1, 1], [], []>} : vector<32x128xbf16>, vector<128x128xbf16>, vector<32x128xf32> -> vector<32x128xf32>
    %c1_40 = arith.constant 1 : index
    %c0_41 = arith.constant 0 : index
    %c0_42 = arith.constant 0 : index
    %54 = vector.load %arg4[%c1_40, %c0_41, %c0_42] : memref<2x128x128xbf16, #tpu.memory_space<vmem>>, vector<1x128x128xbf16>
    %55 = vector.shape_cast %54 : vector<1x128x128xbf16> to vector<128x128xbf16>
    %cst_43 = arith.constant dense<0.000000e+00> : vector<32x128xf32>
    %56 = tpu.matmul %0, %55, %cst_43 {dimension_numbers = #tpu.dot_dimension_numbers<[1], [0], [0], [1], [0, 0, 1, 1], [], []>} : vector<32x128xbf16>, vector<128x128xbf16>, vector<32x128xf32> -> vector<32x128xf32>
    %57 = arith.addf %53, %56 : vector<32x128xf32>
    %c0_44 = arith.constant 0 : index
    %c0_45 = arith.constant 0 : index
    %58 = vector.load %arg5[%c0_44, %c0_45] : memref<1x128xf32, #tpu.memory_space<vmem>>, vector<1x128xf32>
    %59 = vector.broadcast %58 : vector<1x128xf32> to vector<32x128xf32>
    %60 = arith.addf %57, %59 : vector<32x128xf32>
    %c0_46 = arith.constant 0 : index
    %c0_47 = arith.constant 0 : index
    %61 = vector.load %arg6[%c0_46, %c0_47] : memref<32x128xf32, #tpu.memory_space<vmem>>, vector<32x128xf32>
    tpu.vector_store %arg6[%c0_46, %c0_47], %60 {strides = array<i32>} : memref<32x128xf32, #tpu.memory_space<vmem>>, vector<32x128xf32>,
    return
  }
  func.func @transform_0(%arg0: i32) -> (i32, i32) {
    %c0_i32 = arith.constant 0 : i32
    %c0_i32_0 = arith.constant 0 : i32
    return %arg0, %c0_i32 : i32, i32
  }
  func.func @transform_1(%arg0: i32) -> (i32, i32, i32) {
    %c0_i32 = arith.constant 0 : i32
    %c0_i32_0 = arith.constant 0 : i32
    %c0_i32_1 = arith.constant 0 : i32
    %c0_i32_2 = arith.constant 0 : i32
    return %c0_i32, %c0_i32_0, %c0_i32_1 : i32, i32, i32
  }
  func.func @transform_2(%arg0: i32) -> (i32, i32, i32) {
    %c0_i32 = arith.constant 0 : i32
    %c0_i32_0 = arith.constant 0 : i32
    %c0_i32_1 = arith.constant 0 : i32
    %c0_i32_2 = arith.constant 0 : i32
    return %c0_i32, %c0_i32_0, %c0_i32_1 : i32, i32, i32
  }
  func.func @transform_3(%arg0: i32) -> (i32, i32, i32) {
    %c0_i32 = arith.constant 0 : i32
    %c0_i32_0 = arith.constant 0 : i32
    %c0_i32_1 = arith.constant 0 : i32
    %c0_i32_2 = arith.constant 0 : i32
    return %c0_i32, %c0_i32_0, %c0_i32_1 : i32, i32, i32
  }
  func.func @transform_4(%arg0: i32) -> (i32, i32) {
    %c0_i32 = arith.constant 0 : i32
    %c0_i32_0 = arith.constant 0 : i32
    %c0_i32_1 = arith.constant 0 : i32
    return %c0_i32, %c0_i32_0 : i32, i32
  }
  func.func @transform_5(%arg0: i32) -> (i32, i32) {
    %c0_i32 = arith.constant 0 : i32
    %c0_i32_0 = arith.constant 0 : i32
    return %arg0, %c0_i32 : i32, i32
  }
}

</mosaic_0001>

<bundles_post_ra>
// kernel: tpu_custom_call.1
= control target key start
LH: loop header
LB: loop body
LE: loop exit
PB: predicated region body
PF: predicated region fallthrough
CT: control target
= control target key end

     0   :  { %10 = vsyncpa [#allocation3], 0  ;;  %s2178_s0 = inlined_call_operand.hbm [shape: bf16[64,128], index: 0, kind: input, shape index: {}]   ;;  %s2179_s1 = inlined_call_operand.hbm [shape: bf16[5,128,128], index: 1, kind: input, shape index: {}]   ;;  %s2180_s2 = inlined_call_operand.vmem [shape: f32[5,1,128], index: 2, kind: input, shape index: {}]   ;;  %s2181_s3 = inlined_call_operand.hbm [shape: bf16[2,128,128], index: 3, kind: input, shape index: {}]   ;;  %s2182_s4 = inlined_call_operand.vmem [shape: f32[1,128], index: 4, kind: input, shape index: {}]   ;;  %s2183_s5 = inlined_call_operand.hbm [shape: f32[64,128], index: 5, kind: output, shape index: {}]  }
   0x1   :  { %12 = vsyncpa [#allocation3 + $0x1], 0 }
   0x2   :  { %13 = vsyncpa [#allocation6], 0 }
   0x3   :  { %14 = vsyncpa [#allocation4], 0 }
   0x4   :  { %16 = vsyncpa [#allocation4 + $0x1], 0  ;;  %s1904_s18 = smov 0   ;;  %s1906_s19 = smov 0  }
   0x5   :  { %s1908_s20 = smov 0   ;;  %s1910_s21 = smov 0  }
   0x6 LB: > { %s1925_s22 = sadd.s32 4294967295, %s1864_s21   ;;  %s1277_s23 = sadd.s32 4294967294, %s1864_s21   ;;  %s1864_s21 = sphi %s1910_s21, %s2203_s21   ;;  %s1860_s20 = sphi %s1908_s20, %s2202_s20   ;;  %s1856_s19 = sphi %s1906_s19, %s2201_s19   ;;  %s1852_s18 = sphi %s1904_s18, %s2200_s18  }
   0x7   : > { %p42_p0 = scmp.ne.s32.totalorder %s1856_s19, %s1852_s18  ;;  %p2184_p1 = scmp.eq.s32.totalorder %s1925_s22, 0 }
   0x8   : > { %p156_p3 = scmp.eq.s32.totalorder %s1277_s23, 1  ;;  %p1278_p5 = scmp.ge.s32.totalorder %s1864_s21, 1 }
   0x9   : > { %p1934_p4 = por %p2184_p1, %p42_p0  ;;  %p163_p7 = scmp.lt.s32.totalorder %s1864_s21, 3 }
   0xa   : > { %p1939_p6 = por %p156_p3, %p42_p0  ;;  %s1866_s27 = smov [#allocation5]  }
   0xb   : > { %s2187_s24 = scalar_select %p1934_p4, 1, 0 }
   0xc   : > { %s2188_s25 = scalar_select %p1939_p6, 1, 0 }
   0xd   : > { %p1944_p8 = pnand %p1278_p5, %p163_p7  ;;  %s175_s28 = sshll.u32 %s1866_s27, 4  ;;  %s1948_s28 = int_to_ptr.vmem [resolvable:$true] %s175_s28 }
   0xe   : > { %s1867_s30 = smov [#allocation7]   ;;  %s1708_s9 = scalar_lea.hbm %s2179_s1, 5120 }
   0xf   : > { %p1591_p9 = pneg %p1944_p8  ;;  %s191_s6 = sshll.u32 %s1867_s30, 4  ;;  %s1959_s6 = int_to_ptr.vmem [resolvable:$true] %s191_s6 }
  0x10   : > { %p1709_p12 = scmp.ne.s32.totalorder %s2179_s1, %s1708_s9  ;;  %p1715_p5 = scmp.lt.u32.totalorder %s1708_s9, %s2179_s1 }
  0x11   : > { %p1955_p11 = pnand %p1591_p9, %p2184_p1 }
  0x13   : > { %p1710_p13 = pneg %p1955_p11 }
  0x15   : > { %p1711_p0 = pnand %p1710_p13, %p1709_p12 }
  0x17   : > { %p1712_p3 = pneg %p1711_p0 }
  0x19   : > { %p1717_p7 = pnand %p1715_p5, %p1712_p3 }
  0x1b   : > { %1720 = shalt.err (!%p1717_p7)
}
  0x1c   : > { %s1721_s14 = scalar_lea.vmem %s1948_s28, 5120  ;;  %p1729_p2 = scmp.lt.s32.totalorder %s1948_s28, %s1948_s28 }
  0x1d   : > { %p1722_p9 = scmp.ne.s32.totalorder %s1948_s28, %s1721_s14  ;;  %p1730_p12 = scmp.lt.s32.totalorder %s1721_s14, %s1721_s14 }
  0x1f   : > { %p1724_p10 = pnand %p1722_p9, %p1710_p13  ;;  %p1731_p0 = por %p1730_p12, %p1729_p2 }
  0x21   : > { %p1725_p1 = pneg %p1724_p10 }
  0x23   : > { %p1732_p6 = pnand %p1731_p0, %p1725_p1 }
  0x25   : > { %1735 = shalt.err (!%p1732_p6)
}
  0x26   : > { %s1868_s15 = smov 64   ;;  %s1869_s16 = smov 4  }
  0x27   : > { %1594 = dma.hbm_to_vmem [thread:$0]  (!%p1955_p11), %s2179_s1, 5120, %s1948_s28, [#allocation6], %s1868_s15, %s1868_s15, %s1869_s16  }
  0x28   : > { %s1736_s7 = scalar_lea.hbm %s2181_s3, 2048 }
  0x29   : > { %p1737_p1 = scmp.ne.s32.totalorder %s2181_s3, %s1736_s7  ;;  %p1743_p10 = scmp.lt.u32.totalorder %s1736_s7, %s2181_s3 }
  0x2b   : > { %p1739_p2 = pnand %p1737_p1, %p1710_p13 }
  0x2d   : > { %p1740_p6 = pneg %p1739_p2 }
  0x2f   : > { %p1745_p3 = pnand %p1743_p10, %p1740_p6 }
  0x31   : > { %1748 = shalt.err (!%p1745_p3)
}
  0x32   : > { %s1749_s28 = scalar_lea.vmem %s1959_s6, 2048  ;;  %p1757_p12 = scmp.lt.s32.totalorder %s1959_s6, %s1959_s6 }
  0x33   : > { %p1750_p5 = scmp.ne.s32.totalorder %s1959_s6, %s1749_s28  ;;  %p1758_p0 = scmp.lt.s32.totalorder %s1749_s28, %s1749_s28 }
  0x35   : > { %p1752_p7 = pnand %p1750_p5, %p1710_p13  ;;  %p1759_p1 = por %p1758_p0, %p1757_p12 }
  0x37   : > { %p1753_p9 = pneg %p1752_p7 }
  0x39   : > { %p1760_p2 = pnand %p1759_p1, %p1753_p9 }
  0x3b   : > { %1763 = shalt.err (!%p1760_p2)
}
  0x3c   : > { %1597 = dma.hbm_to_vmem [thread:$0]  (!%p1955_p11), %s2181_s3, 2048, %s1959_s6, [#allocation6], %s1868_s15, %s1868_s15, %s1869_s16  }
  0x3d   : > { %s2020_s29 = sadd.s32 1, %s1864_s21   ;;  %s29_s14 = sadd.s32 1, %s1860_s20 }
  0x3e   : > { %s26_s17 = ssub.s32 %s1864_s21, %s2020_s29  ;;  %p36_p13 = scmp.ne.s32.totalorder %s1860_s20, %s1856_s19 }
  0x3f   : > { %p27_p6 = scmp.eq.s32.totalorder %s26_s17, 0  ;;  %p37_p10 = scmp.eq.s32.totalorder %s1864_s21, 0 }
  0x40   : > { %p2191_p3 = scmp.eq.s32.totalorder %s1925_s22, 1  ;;  %p1608_p7 = scmp.lt.s32.totalorder %s1864_s21, 2 }
  0x41   : > { %s2036_s27 = scalar_select %p27_p6, %s1860_s20, %s29_s14  }
  0x42   : > { %p2030_p5 = por %p2191_p3, %p36_p13  ;;  %p38_p9 = por %p37_p10, %p36_p13 }
  0x43   : > { %s208_s30 = sand.u32 1, %s1860_s20   ;;  %s1363_s6 = sshll.u32 %s1864_s21, 8 }
  0x44   : > { %s2192_s23 = scalar_select %p2030_p5, 1, 0 }
  0x45   : > { %s1282_s7 = sshll.u32 %s208_s30, 4  ;;  %s2043_s10 = scalar_lea.hbm %s2178_s0, %s1363_s6 }
  0x46   : > { %s212_s11 = scalar_lea.vmem [#allocation2], %s1282_s7  ;;  %p2047_p11 = pnand %p1608_p7, %p38_p9 }
  0x47   : > { %s219_s28 = sshll.u32 %s212_s11, 4  ;;  %s2051_s13 = scalar_lea.sflag [#allocation3], %s208_s30  ;;  %s2045_s28 = int_to_ptr.vmem [resolvable:$true] %s219_s28 }
  0x48   : > { %s1764_s14 = scalar_lea.hbm %s2043_s10, 256  ;;  %p1766_p0 = pneg %p2047_p11 }
  0x49   : > { %p1765_p12 = scmp.ne.s32.totalorder %s2043_s10, %s1764_s14  ;;  %s1769_s6 = scalar_lea.hbm %s2178_s0, 512 }
  0x4a   : > { %p1770_p13 = scmp.lt.u32.totalorder %s2043_s10, %s2178_s0  ;;  %p1771_p6 = scmp.lt.u32.totalorder %s1769_s6, %s1764_s14 }
  0x4b   : > { %p1767_p1 = pnand %p1766_p0, %p1765_p12  ;;  %p1773_p3 = scmp.lt.u32.totalorder %s1764_s14, %s2043_s10 }
  0x4c   : > { %p1772_p10 = por %p1771_p6, %p1770_p13 }
  0x4d   : > { %p1768_p2 = pneg %p1767_p1 }
  0x4e   : > { %p1774_p7 = por %p1773_p3, %p1772_p10 }
  0x50   : > { %p1775_p9 = pnand %p1774_p7, %p1768_p2 }
  0x52   : > { %1778 = shalt.err (!%p1775_p9)
}
  0x53   : > { %s1779_s30 = scalar_lea.vmem %s2045_s28, 256  ;;  %s1870_s11 = smov [#allocation2]  }
  0x54   : > { %p1780_p12 = scmp.ne.s32.totalorder %s2045_s28, %s1779_s30  ;;  %s1784_s17 = sshll.u32 %s1870_s11, 4  ;;  %s1785_s17 = int_to_ptr.vmem [resolvable:$false] %s1784_s17 }
  0x55   : > { %s1786_s7 = scalar_lea.vmem %s1785_s17, 512  ;;  %p1787_p4 = scmp.lt.s32.totalorder %s2045_s28, %s1785_s17 }
  0x56   : > { %p1782_p1 = pnand %p1780_p12, %p1766_p0  ;;  %p1788_p13 = scmp.lt.s32.totalorder %s1786_s7, %s1779_s30 }
  0x58   : > { %p1783_p5 = pneg %p1782_p1  ;;  %p1789_p6 = por %p1788_p13, %p1787_p4 }
  0x5a   : > { %p1790_p10 = pnand %p1789_p6, %p1783_p5 }
  0x5c   : > { %1793 = shalt.err (!%p1790_p10)
}
  0x5d   : > { %1601 = dma.hbm_to_vmem [thread:$0]  (!%p2047_p11), %s2043_s10, 256, %s2045_s28, %s2051_s13, %s1868_s15, %s1868_s15, %s1869_s16  }
  0x5e   : > { %231 = sbr.rel (%p1944_p8) target bundleno = 1480 (0x5c8), region = 40  ;;  %s2085_s14 = sand.u32 (!%p1944_p8), 1, %s1856_s19  }
  0x5f   : > { %s1286_s6 = sshll.u32 (!%p1944_p8), %s2085_s14, 4  ;;  %s234_s8 = scalar_lea.sflag (!%p1944_p8), [#allocation3], %s2085_s14 }
  0x60   : > { %s2089_s9 = scalar_lea.vmem (!%p1944_p8), [#allocation2], %s1286_s6  ;;  %p2194_p4 = scmp.ne.s32.totalorder (!%p1944_p8), %s2187_s24, 0 }
  0x65   : > { %1839 = dma.done.wait (%p2194_p4), %s234_s8, 256  }
  0x66   : > { %1841 = vsyncadd (%p2194_p4), %s234_s8, 4294967040  ;;  %p2195_p5 = scmp.eq.s32.totalorder %s1925_s22, 0 }
  0x68   : > { %1843 = dma.done.wait (%p2195_p5), [#allocation6], 7168   ;;  %p2196_p8 = pmov %p2195_p5 }
  0x69   : > { %v1650_v0 = vld [vmem:[#allocation5] sm:$0xff]   ;;  %v1651_v1 = vld [vmem:[#allocation5 + $0x8] sm:$0xff]   ;;  %v1652_v2 = vld [vmem:[#allocation5 + $0x10] sm:$0xff]   ;;  %s1289_s17 = sshll.u32 %s2085_s14, 5  ;;  %s1364_s24 = sshll.u32 %s1925_s22, 9 }
  0x6a   : > { %1845 = vsyncadd (%p2196_p8), [#allocation6], 4294960128  ;;  %1435 = vmatprep.subr.bf16.mxu0 %v1650_v0  ;;  %v1653_v3 = vld [vmem:[#allocation5 + $0x18] sm:$0xff]   ;;  %v2100_v4 = vld [vmem:[%s2089_s9] sm:$0xff]   ;;  %s271_s8 = scalar_lea.vmem [#allocation8], %s1289_s17  ;;  %s2134_s16 = scalar_lea.hbm %s2183_s5, %s1364_s24 }
  0x6b   : > { %1436 = vmatpush3.bf16.msra.mxu0 %v1650_v0  ;;  %1451 = vmatprep.mubr.bf16.mxu0 %v2100_v4  ;;  %v1660_v5 = vld [vmem:[#allocation5 + $0x40] sm:$0xff]   ;;  %v1661_v6 = vld [vmem:[#allocation5 + $0x48] sm:$0xff]   ;;  %v1662_v8 = vld [vmem:[#allocation5 + $0x50] sm:$0xff]   ;;  %s1172_s22 = scalar_lea.sflag [#allocation4], %s2085_s14  ;;  %p2197_p0 = scmp.ne.s32.totalorder %s2192_s23, 0 }
  0x6c   : > { %1437 = vmatprep.subr.bf16.mxu0 %v1651_v1  ;;  %v1654_v7 = vld [vmem:[#allocation5 + $0x20] sm:$0xff]   ;;  %1455 = vmatprep.subr.bf16.mxu1 %v1660_v5  ;;  %v1655_v9 = vld [vmem:[#allocation5 + $0x28] sm:$0xff]   ;;  %v1663_v10 = vld [vmem:[#allocation5 + $0x58] sm:$0xff]   ;;  %s1871_s28 = smov [#allocation8]  }
  0x6d   : > { %1456 = vmatpush3.bf16.msra.mxu1 %v1660_v5  ;;  %v1656_v11 = vld [vmem:[#allocation5 + $0x30] sm:$0xff]   ;;  %v1664_v12 = vld [vmem:[#allocation5 + $0x60] sm:$0xff]   ;;  %v1657_v13 = vld [vmem:[#allocation5 + $0x38] sm:$0xff]   ;;  %s1798_s12 = sshll.u32 %s1871_s28, 4  ;;  %s1799_s12 = int_to_ptr.vmem [resolvable:$false] %s1798_s12 }
  0x6e   : > { %1457 = vmatprep.subr.bf16.mxu1 %v1661_v6  ;;  %v1665_v14 = vld [vmem:[#allocation5 + $0x68] sm:$0xff]   ;;  %v1666_v16 = vld [vmem:[#allocation5 + $0x70] sm:$0xff]   ;;  %v1667_v17 = vld [vmem:[#allocation5 + $0x78] sm:$0xff]   ;;  %s1800_s13 = scalar_lea.vmem %s1799_s12, 1024 }
  0x6f   : > { %1438 = vmatpush3.bf16.msra.mxu0 %v1651_v1  ;;  %v2104_v15 = vld [vmem:[%s2089_s9 + $0x8] sm:$0xff]   ;;  %v1668_v18 = vld [vmem:[#allocation5 + $0x80] sm:$0xff]   ;;  %v1670_v20 = vld [vmem:[#allocation5 + $0x90] sm:$0xff]   ;;  %s1185_s9 = sshll.u32 %s271_s8, 4  ;;  %s2129_s9 = int_to_ptr.vmem [resolvable:$true] %s1185_s9 }
  0x70   : > { %1439 = vmatprep.subr.bf16.mxu0 %v1652_v2  ;;  %v1669_v19 = vld [vmem:[#allocation5 + $0x88] sm:$0xff]   ;;  %v1671_v21 = vld [vmem:[#allocation5 + $0x98] sm:$0xff]   ;;  %v1672_v22 = vld [vmem:[#allocation5 + $0xa0] sm:$0xff]   ;;  %s1794_s10 = scalar_lea.vmem %s2129_s9, 512  ;;  %p1801_p7 = scmp.lt.s32.totalorder %s2129_s9, %s1799_s12 }
  0x71   : > { %1458 = vmatpush3.bf16.msra.mxu1 %v1661_v6  ;;  %v1673_v23 = vld [vmem:[#allocation5 + $0xa8] sm:$0xff]   ;;  %v1290_v24 = vld [vmem:[%s2180_s2] ss:$0 sm:$0xff]  ;;  %v1674_v39 = vld [vmem:[#allocation5 + $0xb0] sm:$0xff]   ;;  %p1795_p11 = scmp.ne.s32.totalorder %s2129_s9, %s1794_s10  ;;  %p1802_p9 = scmp.lt.s32.totalorder %s1800_s13, %s1794_s10 }
  0x72   : > { %1459 = vmatprep.subr.bf16.mxu1 %v1662_v8  ;;  %v1675_v40 = vld [vmem:[#allocation5 + $0xb8] sm:$0xff]   ;;  %v1676_v41 = vld [vmem:[#allocation5 + $0xc0] sm:$0xff]   ;;  %v1677_v42 = vld [vmem:[#allocation5 + $0xc8] sm:$0xff]  }
  0x73   : > { %1440 = vmatpush3.bf16.msra.mxu0 %v1652_v2  ;;  %v1678_v43 = vld [vmem:[#allocation5 + $0xd0] sm:$0xff]   ;;  %v1679_v44 = vld [vmem:[#allocation5 + $0xd8] sm:$0xff]   ;;  %v1680_v45 = vld [vmem:[#allocation5 + $0xe0] sm:$0xff]   ;;  %p1796_p2 = pnand %p1795_p11, %p2197_p0  ;;  %p1803_p12 = por %p1802_p9, %p1801_p7 }
  0x74   : > { %1441 = vmatprep.subr.bf16.mxu0 %v1653_v3  ;;  %v1681_v46 = vld [vmem:[#allocation5 + $0xe8] sm:$0xff]   ;;  %v1302_v47 = vld [vmem:[%s2180_s2 + $0x1] ss:$0 sm:$0xff]  ;;  %v1682_v62 = vld [vmem:[#allocation5 + $0xf0] sm:$0xff]  }
  0x75   : > { %1460 = vmatpush3.bf16.msra.mxu1 %v1662_v8  ;;  %v1683_v63 = vld [vmem:[#allocation5 + $0xf8] sm:$0xff]   ;;  %v1684_v0 = vld [vmem:[#allocation5 + $0x100] sm:$0xff]   ;;  %v1685_v1 = vld [vmem:[#allocation5 + $0x108] sm:$0xff]   ;;  %p1797_p3 = pneg %p1796_p2 }
  0x76   : > { %1461 = vmatprep.subr.bf16.mxu1 %v1663_v10  ;;  %v1686_v2 = vld [vmem:[#allocation5 + $0x110] sm:$0xff]   ;;  %v1688_v5 = vld [vmem:[#allocation5 + $0x120] sm:$0xff]   ;;  %v1689_v6 = vld [vmem:[#allocation5 + $0x128] sm:$0xff]  }
  0x77   : > { %1442 = vmatpush3.bf16.msra.mxu0 %v1653_v3  ;;  %v1687_v3 = vld [vmem:[#allocation5 + $0x118] sm:$0xff]   ;;  %p1804_p1 = pnand %p1803_p12, %p1797_p3 }
  0x78   : > { %1443 = vmatprep.subr.bf16.mxu0 %v1654_v7 }
  0x79   : > { %1462 = vmatpush3.bf16.msra.mxu1 %v1663_v10 }
  0x7a   : > { %1463 = vmatprep.subr.bf16.mxu1 %v1664_v12 }
  0x7b   : > { %1444 = vmatpush3.bf16.msra.mxu0 %v1654_v7  ;;  %v1312_v7 = vld [vmem:[%s2180_s2 + $0x2] ss:$0 sm:$0xff] }
  0x7c   : > { %1445 = vmatprep.subr.bf16.mxu0 %v1655_v9 }
  0x7d   : > { %1464 = vmatpush3.bf16.msra.mxu1 %v1664_v12 }
  0x7e   : > { %1465 = vmatprep.subr.bf16.mxu1 %v1665_v14 }
  0x7f   : > { %1446 = vmatpush3.bf16.msra.mxu0 %v1655_v9 }
  0x80   : > { %1447 = vmatprep.subr.bf16.mxu0 %v1656_v11 }
  0x81   : > { %1466 = vmatpush3.bf16.msra.mxu1 %v1665_v14 }
  0x82   : > { %1467 = vmatprep.subr.bf16.mxu1 %v1666_v16 }
  0x83   : > { %1448 = vmatpush3.bf16.msra.mxu0 %v1656_v11 }
  0x84   : > { %1449 = vmatprep.subr.bf16.mxu0 %v1657_v13 }
  0x85   : > { %1468 = vmatpush3.bf16.msra.mxu1 %v1666_v16 }
  0x86   : > { %1469 = vmatprep.subr.bf16.mxu1 %v1667_v17 }
  0x87   : > { %1450 = vmatpush3.bf16.msra.mxu0 %v1657_v13 }
  0x88   : > { %1475 = vmatprep.subr.bf16.mxu0 %v1668_v18 }
  0x89   : > { %1470 = vmatpush3.bf16.msra.mxu1 %v1667_v17 }
  0x8a   : > { %1452 = vmatmul.mubr.bf16.vlgmr.msra.gmra.mrb[0].mxu0 %v2104_v15  ;;  %1495 = vmatprep.subr.bf16.mxu1 %v1676_v41 }
  0x8b   : > { %1476 = vmatpush3.bf16.msra.mxu0 %v1668_v18 }
  0x8c   : > { %1477 = vmatprep.subr.bf16.mxu0 %v1669_v19 }
  0x8f   : > { %1478 = vmatpush3.bf16.msra.mxu0 %v1669_v19 }
  0x90   : > { %1479 = vmatprep.subr.bf16.mxu0 %v1670_v20 }
  0x93   : > { %1480 = vmatpush3.bf16.msra.mxu0 %v1670_v20 }
  0x94   : > { %1481 = vmatprep.subr.bf16.mxu0 %v1671_v21 }
  0x97   : > { %1482 = vmatpush3.bf16.msra.mxu0 %v1671_v21 }
  0x98   : > { %1483 = vmatprep.subr.bf16.mxu0 %v1672_v22 }
  0x9b   : > { %1484 = vmatpush3.bf16.msra.mxu0 %v1672_v22 }
  0x9c   : > { %1485 = vmatprep.subr.bf16.mxu0 %v1673_v23 }
  0x9f   : > { %1486 = vmatpush3.bf16.msra.mxu0 %v1673_v23  ;;  %v1690_v23 = vld [vmem:[#allocation5 + $0x130] sm:$0xff]  }
  0xa0   : > { %1487 = vmatprep.subr.bf16.mxu0 %v1674_v39 }
  0xa3   : > { %1488 = vmatpush3.bf16.msra.mxu0 %v1674_v39 }
  0xa4   : > { %1489 = vmatprep.subr.bf16.mxu0 %v1675_v40 }
  0xa7   : > { %1490 = vmatpush3.bf16.msra.mxu0 %v1675_v40 }
  0xa8   : > { %1515 = vmatprep.subr.bf16.mxu0 %v1684_v0 }
 0x15d   : > { %v1453_v25 = vpop.f32.mrb[0].mxu0 }
 0x15e   : > { %v405_v26 = vadd.f32 %v1453_v25, %v1290_v24  ;;  %v396_v27 = vpop.f32.mrb[1].mxu0  ;;  %v1692_v25 = vld [vmem:[#allocation7 + $0x40] sm:$0xff]  }
 0x15f   : > { %v397_v28 = vadd.f32 %v1290_v24, %v396_v27  ;;  %v1454_v29 = vpop.f32.mrb[2].mxu0  ;;  %v1694_v27 = vld [vmem:[#allocation7 + $0x50] sm:$0xff]  }
 0x160   : > { %v408_v30 = vadd.f32 %v1454_v29, %v1290_v24  ;;  %v399_v31 = vpop.f32.mrb[3].mxu0  ;;  %v413_v33 = vmax.f32 %v405_v26, 0.0  ;;  %v1693_v26 = vld [vmem:[#allocation7 + $0x48] sm:$0xff]   ;;  %v1696_v29 = vld [vmem:[#allocation7 + $0x60] sm:$0xff]  }
 0x161   : > { %v400_v32 = vadd.f32 %v1290_v24, %v399_v31  ;;  %v411_v35 = vmax.f32 %v397_v28, 0.0  ;;  %v1691_v24 = vld [vmem:[#allocation5 + $0x138] sm:$0xff]  }
 0x162   : > { %v414_v34 = vmax.f32 %v408_v30, 0.0  ;;  %v1695_v28 = vld [vmem:[#allocation7 + $0x58] sm:$0xff]   ;;  %v1698_v30 = vld [vmem:[#allocation7 + $0x70] sm:$0xff]  }
 0x163   : > { %v412_v36 = vmax.f32 %v400_v32, 0.0  ;;  %v1699_v31 = vld [vmem:[#allocation7 + $0x78] sm:$0xff]   ;;  %v1700_v32 = vld [vmem:[#allocation7] sm:$0xff]  }
 0x164   : > { %v416_v37 = vpack.c.bf16 %v414_v34, %v413_v33  ;;  %v1701_v33 = vld [vmem:[#allocation7 + $0x8] sm:$0xff]   ;;  %v1702_v34 = vld [vmem:[#allocation7 + $0x10] sm:$0xff]  }
 0x165   : > { %v415_v38 = vpack.c.bf16 %v412_v36, %v411_v35  ;;  %v1703_v35 = vld [vmem:[#allocation7 + $0x18] sm:$0xff]   ;;  %v1704_v36 = vld [vmem:[#allocation7 + $0x20] sm:$0xff]  }
 0x167   : > { %1471 = vmatprep.mubr.bf16.mxu1 %v415_v38  ;;  %v1322_v38 = vld [vmem:[%s2180_s2 + $0x3] ss:$0 sm:$0xff] }
 0x168   : > { %1472 = vmatmul.mubr.bf16.vlgmr.msra.gmra.mrb[0].mxu1 %v416_v37  ;;  %v1705_v37 = vld [vmem:[#allocation7 + $0x28] sm:$0xff]  }
 0x169   : > { %1496 = vmatpush3.bf16.msra.mxu1 %v1676_v41 }
 0x16a   : > { %1497 = vmatprep.subr.bf16.mxu1 %v1677_v42 }
 0x16d   : > { %1498 = vmatpush3.bf16.msra.mxu1 %v1677_v42 }
 0x16e   : > { %1499 = vmatprep.subr.bf16.mxu1 %v1678_v43 }
 0x171   : > { %1500 = vmatpush3.bf16.msra.mxu1 %v1678_v43 }
 0x172   : > { %1501 = vmatprep.subr.bf16.mxu1 %v1679_v44 }
 0x175   : > { %1502 = vmatpush3.bf16.msra.mxu1 %v1679_v44 }
 0x176   : > { %1503 = vmatprep.subr.bf16.mxu1 %v1680_v45 }
 0x179   : > { %1504 = vmatpush3.bf16.msra.mxu1 %v1680_v45 }
 0x17a   : > { %1505 = vmatprep.subr.bf16.mxu1 %v1681_v46 }
 0x17d   : > { %1506 = vmatpush3.bf16.msra.mxu1 %v1681_v46 }
 0x17e   : > { %1507 = vmatprep.subr.bf16.mxu1 %v1682_v62 }
 0x181   : > { %1508 = vmatpush3.bf16.msra.mxu1 %v1682_v62 }
 0x182   : > { %1509 = vmatprep.subr.bf16.mxu1 %v1683_v63 }
 0x185   : > { %1510 = vmatpush3.bf16.msra.mxu1 %v1683_v63 }
 0x186   : > { %1535 = vmatprep.subr.bf16.mxu1 %v1692_v25 }
 0x23b   : > { %v1473_v48 = vpop.f32.mrb[0].mxu1 }
 0x23c   : > { %v533_v49 = vadd.f32 %v1473_v48, %v1302_v47  ;;  %v524_v50 = vpop.f32.mrb[1].mxu1 }
 0x23d   : > { %v525_v51 = vadd.f32 %v1302_v47, %v524_v50  ;;  %v1474_v52 = vpop.f32.mrb[2].mxu1 }
 0x23e   : > { %v536_v53 = vadd.f32 %v1474_v52, %v1302_v47  ;;  %v527_v54 = vpop.f32.mrb[3].mxu1  ;;  %v541_v56 = vmax.f32 %v533_v49, 0.0  ;;  %v1706_v52 = vld [vmem:[#allocation7 + $0x30] sm:$0xff]  }
 0x23f   : > { %v528_v55 = vadd.f32 %v1302_v47, %v527_v54  ;;  %v539_v58 = vmax.f32 %v525_v51, 0.0  ;;  %v1332_v54 = vld [vmem:[%s2180_s2 + $0x4] ss:$0 sm:$0xff] }
 0x240   : > { %v542_v57 = vmax.f32 %v536_v53, 0.0  ;;  %v1707_v53 = vld [vmem:[#allocation7 + $0x38] sm:$0xff]  }
 0x241   : > { %v540_v59 = vmax.f32 %v528_v55, 0.0 }
 0x242   : > { %v544_v60 = vpack.c.bf16 %v542_v57, %v541_v56 }
 0x243   : > { %v543_v61 = vpack.c.bf16 %v540_v59, %v539_v58 }
 0x245   : > { %1491 = vmatprep.mubr.bf16.mxu0 %v543_v61 }
 0x246   : > { %1492 = vmatmul.mubr.bf16.vlgmr.msra.gmra.mrb[4].mxu0 %v544_v60 }
 0x247   : > { %1516 = vmatpush3.bf16.msra.mxu0 %v1684_v0 }
 0x248   : > { %1517 = vmatprep.subr.bf16.mxu0 %v1685_v1 }
 0x24b   : > { %1518 = vmatpush3.bf16.msra.mxu0 %v1685_v1 }
 0x24c   : > { %1519 = vmatprep.subr.bf16.mxu0 %v1686_v2 }
 0x24f   : > { %1520 = vmatpush3.bf16.msra.mxu0 %v1686_v2 }
 0x250   : > { %1521 = vmatprep.subr.bf16.mxu0 %v1687_v3 }
 0x253   : > { %1522 = vmatpush3.bf16.msra.mxu0 %v1687_v3 }
 0x254   : > { %1523 = vmatprep.subr.bf16.mxu0 %v1688_v5 }
 0x257   : > { %1524 = vmatpush3.bf16.msra.mxu0 %v1688_v5 }
 0x258   : > { %1525 = vmatprep.subr.bf16.mxu0 %v1689_v6 }
 0x25b   : > { %1526 = vmatpush3.bf16.msra.mxu0 %v1689_v6  ;;  %v1357_v6 = vld [vmem:[%s2182_s4] ss:$0 sm:$0xff] }
 0x25c   : > { %1527 = vmatprep.subr.bf16.mxu0 %v1690_v23 }
 0x25f   : > { %1528 = vmatpush3.bf16.msra.mxu0 %v1690_v23 }
 0x260   : > { %1529 = vmatprep.subr.bf16.mxu0 %v1691_v24 }
 0x263   : > { %1530 = vmatpush3.bf16.msra.mxu0 %v1691_v24 }
 0x319   : > { %v1493_v8 = vpop.f32.mrb[4].mxu0 }
 0x31a   : > { %v661_v9 = vadd.f32 %v1493_v8, %v1312_v7  ;;  %v652_v10 = vpop.f32.mrb[5].mxu0 }
 0x31b   : > { %v653_v11 = vadd.f32 %v1312_v7, %v652_v10  ;;  %v1494_v12 = vpop.f32.mrb[6].mxu0 }
 0x31c   : > { %v664_v13 = vadd.f32 %v1494_v12, %v1312_v7  ;;  %v655_v14 = vpop.f32.mrb[7].mxu0  ;;  %v669_v17 = vmax.f32 %v661_v9, 0.0 }
 0x31d   : > { %v656_v16 = vadd.f32 %v1312_v7, %v655_v14  ;;  %v667_v19 = vmax.f32 %v653_v11, 0.0 }
 0x31e   : > { %v670_v18 = vmax.f32 %v664_v13, 0.0 }
 0x31f   : > { %v668_v20 = vmax.f32 %v656_v16, 0.0 }
 0x320   : > { %v672_v21 = vpack.c.bf16 %v670_v18, %v669_v17 }
 0x321   : > { %v671_v22 = vpack.c.bf16 %v668_v20, %v667_v19 }
 0x323   : > { %1511 = vmatprep.mubr.bf16.mxu1 %v671_v22 }
 0x324   : > { %1512 = vmatmul.mubr.bf16.vlgmr.msra.gmra.mrb[4].mxu1 %v672_v21 }
 0x325   : > { %1551 = vmatprep.mubr.bf16.mxu1 %v2100_v4  ;;  %1536 = vmatpush3.bf16.msra.mxu1 %v1692_v25  ;;  %v1697_v4 = vld [vmem:[#allocation7 + $0x68] sm:$0xff]  }
 0x326   : > { %1537 = vmatprep.subr.bf16.mxu1 %v1693_v26 }
 0x329   : > { %1538 = vmatpush3.bf16.msra.mxu1 %v1693_v26 }
 0x32a   : > { %1539 = vmatprep.subr.bf16.mxu1 %v1694_v27 }
 0x32d   : > { %1540 = vmatpush3.bf16.msra.mxu1 %v1694_v27 }
 0x32e   : > { %1541 = vmatprep.subr.bf16.mxu1 %v1695_v28 }
 0x331   : > { %1542 = vmatpush3.bf16.msra.mxu1 %v1695_v28 }
 0x332   : > { %1543 = vmatprep.subr.bf16.mxu1 %v1696_v29 }
 0x335   : > { %1544 = vmatpush3.bf16.msra.mxu1 %v1696_v29 }
 0x336   : > { %1545 = vmatprep.subr.bf16.mxu1 %v1697_v4 }
 0x339   : > { %1546 = vmatpush3.bf16.msra.mxu1 %v1697_v4 }
 0x33a   : > { %1547 = vmatprep.subr.bf16.mxu1 %v1698_v30 }
 0x33d   : > { %1548 = vmatpush3.bf16.msra.mxu1 %v1698_v30 }
 0x33e   : > { %1549 = vmatprep.subr.bf16.mxu1 %v1699_v31 }
 0x341   : > { %1550 = vmatpush3.bf16.msra.mxu1 %v1699_v31 }
 0x342   : > { %1555 = vmatprep.subr.bf16.mxu1 %v1700_v32 }
 0x344   : > { %1552 = vmatmul.mubr.bf16.vlgmr.msra.gmra.mrb[8].mxu1 %v2104_v15 }
 0x345   : > { %1556 = vmatpush3.bf16.msra.mxu1 %v1700_v32 }
 0x346   : > { %1557 = vmatprep.subr.bf16.mxu1 %v1701_v33 }
 0x349   : > { %1558 = vmatpush3.bf16.msra.mxu1 %v1701_v33 }
 0x34a   : > { %1559 = vmatprep.subr.bf16.mxu1 %v1702_v34 }
 0x34d   : > { %1560 = vmatpush3.bf16.msra.mxu1 %v1702_v34 }
 0x34e   : > { %1561 = vmatprep.subr.bf16.mxu1 %v1703_v35 }
 0x351   : > { %1562 = vmatpush3.bf16.msra.mxu1 %v1703_v35 }
 0x352   : > { %1563 = vmatprep.subr.bf16.mxu1 %v1704_v36 }
 0x355   : > { %1564 = vmatpush3.bf16.msra.mxu1 %v1704_v36 }
 0x356   : > { %1565 = vmatprep.subr.bf16.mxu1 %v1705_v37 }
 0x359   : > { %1566 = vmatpush3.bf16.msra.mxu1 %v1705_v37 }
 0x35a   : > { %1567 = vmatprep.subr.bf16.mxu1 %v1706_v52 }
 0x35d   : > { %1568 = vmatpush3.bf16.msra.mxu1 %v1706_v52 }
 0x35e   : > { %1569 = vmatprep.subr.bf16.mxu1 %v1707_v53 }
 0x361   : > { %1570 = vmatpush3.bf16.msra.mxu1 %v1707_v53 }
 0x3f7   : > { %v1513_v15 = vpop.f32.mrb[4].mxu1 }
 0x3f8   : > { %v789_v39 = vadd.f32 %v1513_v15, %v1322_v38  ;;  %v780_v40 = vpop.f32.mrb[5].mxu1 }
 0x3f9   : > { %v781_v41 = vadd.f32 %v1322_v38, %v780_v40  ;;  %v1514_v42 = vpop.f32.mrb[6].mxu1 }
 0x3fa   : > { %v792_v43 = vadd.f32 %v1514_v42, %v1322_v38  ;;  %v783_v44 = vpop.f32.mrb[7].mxu1  ;;  %v797_v46 = vmax.f32 %v789_v39, 0.0 }
 0x3fb   : > { %v784_v45 = vadd.f32 %v1322_v38, %v783_v44  ;;  %v795_v48 = vmax.f32 %v781_v41, 0.0 }
 0x3fc   : > { %v798_v47 = vmax.f32 %v792_v43, 0.0 }
 0x3fd   : > { %v796_v49 = vmax.f32 %v784_v45, 0.0 }
 0x3fe   : > { %v800_v50 = vpack.c.bf16 %v798_v47, %v797_v46 }
 0x3ff   : > { %v799_v51 = vpack.c.bf16 %v796_v49, %v795_v48 }
 0x401   : > { %1531 = vmatprep.mubr.bf16.mxu0 %v799_v51 }
 0x402   : > { %1532 = vmatmul.mubr.bf16.vlgmr.msra.gmra.mrb[8].mxu0 %v800_v50 }
 0x4d5   : > { %v1533_v55 = vpop.f32.mrb[8].mxu0 }
 0x4d6   : > { %v917_v56 = vadd.f32 %v1533_v55, %v1332_v54  ;;  %v908_v57 = vpop.f32.mrb[9].mxu0 }
 0x4d7   : > { %v909_v58 = vadd.f32 %v1332_v54, %v908_v57  ;;  %v1534_v59 = vpop.f32.mrb[10].mxu0 }
 0x4d8   : > { %v920_v60 = vadd.f32 %v1534_v59, %v1332_v54  ;;  %v911_v61 = vpop.f32.mrb[11].mxu0  ;;  %v925_v63 = vmax.f32 %v917_v56, 0.0 }
 0x4d9   : > { %v912_v62 = vadd.f32 %v1332_v54, %v911_v61  ;;  %v923_v1 = vmax.f32 %v909_v58, 0.0 }
 0x4da   : > { %v926_v0 = vmax.f32 %v920_v60, 0.0 }
 0x4db   : > { %v924_v2 = vmax.f32 %v912_v62, 0.0 }
 0x4dc   : > { %v928_v3 = vpack.c.bf16 %v926_v0, %v925_v63 }
 0x4dd   : > { %v927_v5 = vpack.c.bf16 %v924_v2, %v923_v1 }
 0x4df   : > { %1571 = vmatprep.mubr.bf16.mxu1 %v927_v5 }
 0x4e0   : > { %1572 = vmatmul.mubr.bf16.vlgmr.msra.gmra.mrb[8].mxu1 %v928_v3 }
 0x5b3   : > { %v1573_v7 = vpop.f32.mrb[8].mxu1 }
 0x5b4   : > { %v1165_v8 = vadd.f32 %v1573_v7, %v1357_v6  ;;  %v1141_v9 = vpop.f32.mrb[9].mxu1 }
 0x5b5   : > { %v1163_v10 = vadd.f32 %v1357_v6, %v1141_v9  ;;  %v1574_v11 = vpop.f32.mrb[10].mxu1 }
 0x5b6   : > { %1169 = vst [vmem:[%s271_s8 + $0x10] sm:$0xff] %v1165_v8  ;;  %v1166_v12 = vadd.f32 %v1574_v11, %v1357_v6  ;;  %v1144_v13 = vpop.f32.mrb[11].mxu1 }
 0x5b7   : > { %1167 = vst [vmem:[%s271_s8] sm:$0xff] %v1163_v10  ;;  %v1164_v14 = vadd.f32 %v1357_v6, %v1144_v13 }
 0x5b8   : > { %1170 = vst [vmem:[%s271_s8 + $0x18] sm:$0xff] %v1166_v12 }
 0x5b9   : > { %1168 = vst [vmem:[%s271_s8 + $0x8] sm:$0xff] %v1164_v14 }
 0x5ba   : > { %1807 = shalt.err (!%p1804_p1)
}
 0x5bb   : > { %s1808_s30 = scalar_lea.hbm %s2134_s16, 512  ;;  %s1812_s7 = scalar_lea.hbm %s2183_s5, 1024 }
 0x5bc   : > { %p1809_p13 = scmp.ne.s32.totalorder %s2134_s16, %s1808_s30  ;;  %p1813_p4 = scmp.lt.u32.totalorder %s2134_s16, %s2183_s5 }
 0x5bd   : > { %p1814_p5 = scmp.lt.u32.totalorder %s1812_s7, %s1808_s30  ;;  %p1816_p11 = scmp.lt.u32.totalorder %s1808_s30, %s2134_s16 }
 0x5be   : > { %p1810_p6 = pnand %p1809_p13, %p2197_p0 }
 0x5bf   : > { %p1815_p8 = por %p1814_p5, %p1813_p4 }
 0x5c0   : > { %p1811_p10 = pneg %p1810_p6 }
 0x5c1   : > { %p1817_p2 = por %p1816_p11, %p1815_p8 }
 0x5c3   : > { %p1818_p3 = pnand %p1817_p2, %p1811_p10 }
 0x5c5   : > { %1821 = shalt.err (!%p1818_p3)
}
 0x5c6   : > { %s1872_s24 = smov 128   ;;  %s1873_s26 = smov 8  }
 0x5c7   : > { %1589 = dma.vmem_to_hbm [thread:$0]  (%p2197_p0), %s2129_s9, 512, %s2134_s16, %s1172_s22, %s1872_s24, %s1872_s24, %s1873_s26  }
 0x5c8 PF: > { %s1200_s15 = sand.u32 1, %s1852_s18   ;;  %p2198_p7 = scmp.ne.s32.totalorder %s2188_s25, 0 }
 0x5c9   : > { %p2199_p9 = scmp.ge.s32.totalorder %s1864_s21, 2  ;;  %s1201_s10 = scalar_lea.sflag [#allocation4], %s1200_s15 }
 0x5cb   : > { %p1603_p12 = pnand %p2199_p9, %p2198_p7 }
 0x5cd   : > { %1847 = dma.done.wait (!%p1603_p12), %s1201_s10, 512  }
 0x5ce   : > { %1849 = vsyncadd (!%p1603_p12), %s1201_s10, 4294966784  ;;  %p19_p1 = scmp.ge.s32.totalorder %s2020_s29, 4   ;;  %s2200_s18 = smov %s1856_s19 }
 0x5cf   : > { %s2201_s19 = smov %s1860_s20  ;;  %s2202_s20 = smov %s2036_s27 }
 0x5d0   : > { %s2203_s21 = smov %s2020_s29  ;;  %21 = sbr.rel (!%p19_p1) target bundleno = 6 (0x6), region = 102 }
 0x5d7   :  { %1206 = vsyncpa [#allocation3], 1 }
 0x5d8   :  { %1208 = vsyncpa [#allocation3 + $0x1], 1 }
 0x5d9   :  { %1209 = vsyncpa [#allocation6], 1 }
 0x5da   :  { %1210 = vsyncpa [#allocation4], 1 }
 0x5db   :  { %1212 = vsyncpa [#allocation4 + $0x1], 1 }

</bundles_post_ra>
